<compile_context>
chip_gen: v7x
topology: tpu7x:2x2x1
jax: 0.10.0
libtpu: 0.0.40
codegen_flags: <defaults>
</compile_context>

<pallas_src>
import functools
import math

import jax
import jax.numpy as jnp
from jax import lax
from jax.experimental import pallas as pl
from jax.experimental.pallas import tpu as pltpu


_MAX_L_TILE = 512  # lane-aligned output tile (multiple of 128) for long sequences


def _sepconv1d_kernel(x_ref, dw_ref, dwb_ref, pw_ref, pwb_ref, out_ref,
                      *, dilation: int, tl: int, n_lt: int, use_mxu: bool):
    # x_ref   : (C_in, L_in)   zero-padded input for this batch element (resident)
    # dw_ref  : (C_in, K)      depthwise taps
    # dwb_ref : (C_in, 1)      depthwise bias
    # pw_ref  : (C_out, C_in)  pointwise projection
    # pwb_ref : (C_out, 1)     pointwise bias
    # out_ref : (C_out, TL)    output tile (L on lanes -> lane-dense stores)
    c_in, k_taps = dw_ref.shape
    c_out = pw_ref.shape[0]

    if n_lt == 1:
        base = 0  # single tile: fully static slicing
    else:
        base = pl.multiple_of(pl.program_id(1) * tl, tl)

    # Depthwise: K unrolled taps, each a shifted per-tap ref slice; only `acc`
    # (C_in, TL) stays live across the loop.
    acc = jnp.zeros((c_in, tl), jnp.float32)
    for kt in range(k_taps):
        x_tap = x_ref[:, pl.ds(base + kt * dilation, tl)].astype(jnp.float32)
        w_tap = dw_ref[:, kt:kt + 1].astype(jnp.float32)          # (C_in, 1)
        acc = acc + x_tap * w_tap
    acc = acc + dwb_ref[...].astype(jnp.float32)                  # depthwise bias

    # Pointwise 1x1 projection: (C_out, C_in) @ (C_in, TL).
    if use_mxu:
        out = jnp.dot(pw_ref[...].astype(jnp.float32), acc,
                      preferred_element_type=jnp.float32)
    else:
        # Tiny channel counts: skip the (nearly empty) MXU pass and do C_in
        # broadcast multiply-adds on the VPU instead.
        out = jnp.zeros((c_out, tl), jnp.float32)
        for ci in range(c_in):
            out = out + (pw_ref[:, ci:ci + 1].astype(jnp.float32)
                         * acc[ci:ci + 1, :])
    out = out + pwb_ref[...].astype(jnp.float32)                  # pointwise bias
    out_ref[...] = out.astype(out_ref.dtype)


def separable_conv1d(x_ncl, dw, dw_b, pw, pw_b, *, padding: int, dilation: int):
    """Equivalent of
       nn.Sequential(nn.Conv1d(C,C,K,padding,dilation,groups=C), nn.Conv1d(C,Cout,1)).

    x_ncl : (N, C_in, L)    dw : (C_in, 1, K)    dw_b : (C_in,)
    pw    : (C_out, C_in, 1)                     pw_b : (C_out,)
    returns (N, C_out, L_out), L_out = L + 2*padding - dilation*(K-1)
    """
    n, c_in, l = x_ncl.shape
    k = dw.shape[-1]
    c_out = pw.shape[0]
    halo = dilation * (k - 1)
    l_out = l + 2 * padding - halo
    if l_out <= 0:
        raise ValueError(f"non-positive output length: {l_out}")

    # Output L tile: whole length if small, else lane-aligned tiles of 512.
    if l_out <= _MAX_L_TILE:
        tl, n_lt = l_out, 1
    else:
        tl = _MAX_L_TILE
        n_lt = (l_out + tl - 1) // tl

    # Pad only the contiguous L axis (no transposes).  Right-pad far enough that
    # every in-kernel tap slice of the last tile is in bounds; the extra zeros
    # only feed output positions that Pallas clips on writeback.
    l_in = n_lt * tl + halo
    xp = jnp.pad(x_ncl, ((0, 0), (0, 0), (padding, l_in - l - padding)))

    dw_ck = dw[:, 0, :]                      # (C_in, K)
    dwb = dw_b.reshape(c_in, 1)              # (C_in, 1)
    pw_oc = pw[:, :, 0]                      # (C_out, C_in)
    pwb = pw_b.reshape(c_out, 1)             # (C_out, 1)

    use_mxu = (c_in * c_out) >= 1024         # tiny projections stay on the VPU

    kernel = functools.partial(_sepconv1d_kernel, dilation=dilation, tl=tl,
                               n_lt=n_lt, use_mxu=use_mxu)

    return pl.pallas_call(
        kernel,
        out_shape=jax.ShapeDtypeStruct((n, c_out, l_out), x_ncl.dtype),
        grid=(n, n_lt),
        in_specs=[
            # Full padded sequence per batch element; block index constant
            # across the L-tile axis so the DMA is not re-issued per tile.
            pl.BlockSpec((None, c_in, l_in), lambda b, lt: (b, 0, 0)),
            pl.BlockSpec((c_in, k), lambda b, lt: (0, 0)),
            pl.BlockSpec((c_in, 1), lambda b, lt: (0, 0)),
            pl.BlockSpec((c_out, c_in), lambda b, lt: (0, 0)),
            pl.BlockSpec((c_out, 1), lambda b, lt: (0, 0)),
        ],
        out_specs=pl.BlockSpec((None, c_out, tl), lambda b, lt: (b, 0, lt)),
        compiler_params=pltpu.CompilerParams(
            dimension_semantics=("parallel", "arbitrary"),
            vmem_limit_bytes=32 * 1024 * 1024),
    )(xp, dw_ck, dwb, pw_oc, pwb)


def _reference(x_ncl, dw, dw_b, pw, pw_b, *, padding, dilation):
    """Pure-JAX reference via lax.conv_general_dilated (matches nn.Conv1d)."""
    c_in = x_ncl.shape[1]
    hp = lax.Precision.HIGHEST
    y = lax.conv_general_dilated(
        x_ncl, dw, window_strides=(1,), padding=[(padding, padding)],
        rhs_dilation=(dilation,), feature_group_count=c_in,
        dimension_numbers=("NCH", "OIH", "NCH"), precision=hp)
    y = y + dw_b[None, :, None]
    z = lax.conv_general_dilated(
        y, pw, window_strides=(1,), padding=[(0, 0)],
        dimension_numbers=("NCH", "OIH", "NCH"), precision=hp)
    return z + pw_b[None, :, None]


def _run_case(key, *, batch, c_in, c_out, kernel_size, padding, dilation, seq_len):
    kx, k1, k2, k3, k4 = jax.random.split(key, 5)
    x = jax.random.normal(kx, (batch, c_in, seq_len), jnp.float32)

    # PyTorch-style uniform(-1/sqrt(fan_in), 1/sqrt(fan_in)) init.
    dw_bound = 1.0 / math.sqrt(1 * kernel_size)      # groups=C_in -> fan_in = K
    dw = jax.random.uniform(k1, (c_in, 1, kernel_size), jnp.float32,
                            -dw_bound, dw_bound)
    dw_b = jax.random.uniform(k2, (c_in,), jnp.float32, -dw_bound, dw_bound)
    pw_bound = 1.0 / math.sqrt(c_in * 1)             # fan_in = C_in
    pw = jax.random.uniform(k3, (c_out, c_in, 1), jnp.float32,
                            -pw_bound, pw_bound)
    pw_b = jax.random.uniform(k4, (c_out,), jnp.float32, -pw_bound, pw_bound)

    out = separable_conv1d(x, dw, dw_b, pw, pw_b, padding=padding,
                           dilation=dilation)
    out = jax.block_until_ready(out)

    ref = _reference(x, dw, dw_b, pw, pw_b, padding=padding, dilation=dilation)
    assert out.shape == ref.shape, (out.shape, ref.shape)
    err = float(jnp.max(jnp.abs(out - ref)))
    assert jnp.allclose(out, ref, atol=2e-3, rtol=2e-3), err


if __name__ == "__main__":
    key = jax.random.PRNGKey(0)
    k_small, k_wide = jax.random.split(key)

    # Tiny channels (module-style demo sizes) -> VPU pointwise path.
    _run_case(k_small, batch=2, c_in=4, c_out=8, kernel_size=3,
              padding=2, dilation=2, seq_len=16)

    # Wider channels -> MXU pointwise path.
    _run_case(k_wide, batch=2, c_in=32, c_out=64, kernel_size=5,
              padding=4, dilation=2, seq_len=24)

    print("KERNEL_OK")
</pallas_src>

<mosaic_0001>
module attributes {stable_mosaic.version = 11 : i64} {
  func.func @_sepconv1d_kernel(%arg0: i32, %arg1: i32, %arg2: memref<1x4x20xf32, #tpu.memory_space<vmem>>, %arg3: memref<4x3xf32, #tpu.memory_space<vmem>>, %arg4: memref<4x1xf32, #tpu.memory_space<vmem>>, %arg5: memref<8x4xf32, #tpu.memory_space<vmem>>, %arg6: memref<8x1xf32, #tpu.memory_space<vmem>>, %arg7: memref<1x8x16xf32, #tpu.memory_space<vmem>>) attributes {dimension_semantics = [#tpu.dimension_semantics<parallel>, #tpu.dimension_semantics<arbitrary>], iteration_bounds = array<i64: 2, 1>, scalar_prefetch = 0 : i64, scratch_operands = 0 : i64, tpu.core_type = #tpu.core_type<tc>, window_params = [{transform_indices = @transform_0, window_bounds = array<i64: 1, 4, 20>}, {pipeline_mode = #tpu.pipeline_mode<synchronous>, transform_indices = @transform_1, window_bounds = array<i64: 4, 3>}, {pipeline_mode = #tpu.pipeline_mode<synchronous>, transform_indices = @transform_2, window_bounds = array<i64: 4, 1>}, {pipeline_mode = #tpu.pipeline_mode<synchronous>, transform_indices = @transform_3, window_bounds = array<i64: 8, 4>}, {pipeline_mode = #tpu.pipeline_mode<synchronous>, transform_indices = @transform_4, window_bounds = array<i64: 8, 1>}, {transform_indices = @transform_5, window_bounds = array<i64: 1, 8, 16>}]} {
    %cst = arith.constant 0.000000e+00 : f32
    %0 = vector.broadcast %cst : f32 to vector<4x16xf32>
    %c0 = arith.constant 0 : index
    %c0_0 = arith.constant 0 : index
    %c0_1 = arith.constant 0 : index
    %1 = vector.load %arg2[%c0, %c0_0, %c0_1] : memref<1x4x20xf32, #tpu.memory_space<vmem>>, vector<1x4x16xf32>
    %2 = vector.shape_cast %1 : vector<1x4x16xf32> to vector<4x16xf32>
    %c0_2 = arith.constant 0 : index
    %c0_3 = arith.constant 0 : index
    %3 = vector.load %arg3[%c0_2, %c0_3] : memref<4x3xf32, #tpu.memory_space<vmem>>, vector<4x1xf32>
    %4 = vector.broadcast %3 : vector<4x1xf32> to vector<4x16xf32>
    %5 = arith.mulf %2, %4 : vector<4x16xf32>
    %6 = arith.addf %0, %5 : vector<4x16xf32>
    %c0_4 = arith.constant 0 : index
    %c0_5 = arith.constant 0 : index
    %c2 = arith.constant 2 : index
    %7 = vector.load %arg2[%c0_4, %c0_5, %c2] : memref<1x4x20xf32, #tpu.memory_space<vmem>>, vector<1x4x16xf32>
    %8 = vector.shape_cast %7 : vector<1x4x16xf32> to vector<4x16xf32>
    %c0_6 = arith.constant 0 : index
    %c1 = arith.constant 1 : index
    %9 = vector.load %arg3[%c0_6, %c1] : memref<4x3xf32, #tpu.memory_space<vmem>>, vector<4x1xf32>
    %10 = vector.broadcast %9 : vector<4x1xf32> to vector<4x16xf32>
    %11 = arith.mulf %8, %10 : vector<4x16xf32>
    %12 = arith.addf %6, %11 : vector<4x16xf32>
    %c0_7 = arith.constant 0 : index
    %c0_8 = arith.constant 0 : index
    %c4 = arith.constant 4 : index
    %13 = vector.load %arg2[%c0_7, %c0_8, %c4] : memref<1x4x20xf32, #tpu.memory_space<vmem>>, vector<1x4x16xf32>
    %14 = vector.shape_cast %13 : vector<1x4x16xf32> to vector<4x16xf32>
    %c0_9 = arith.constant 0 : index
    %c2_10 = arith.constant 2 : index
    %15 = vector.load %arg3[%c0_9, %c2_10] : memref<4x3xf32, #tpu.memory_space<vmem>>, vector<4x1xf32>
    %16 = vector.broadcast %15 : vector<4x1xf32> to vector<4x16xf32>
    %17 = arith.mulf %14, %16 : vector<4x16xf32>
    %18 = arith.addf %12, %17 : vector<4x16xf32>
    %c0_11 = arith.constant 0 : index
    %c0_12 = arith.constant 0 : index
    %19 = vector.load %arg4[%c0_11, %c0_12] : memref<4x1xf32, #tpu.memory_space<vmem>>, vector<4x1xf32>
    %20 = vector.broadcast %19 : vector<4x1xf32> to vector<4x16xf32>
    %21 = arith.addf %18, %20 : vector<4x16xf32>
    %cst_13 = arith.constant 0.000000e+00 : f32
    %22 = vector.broadcast %cst_13 : f32 to vector<8x16xf32>
    %c0_14 = arith.constant 0 : index
    %c0_15 = arith.constant 0 : index
    %23 = vector.load %arg5[%c0_14, %c0_15] : memref<8x4xf32, #tpu.memory_space<vmem>>, vector<8x1xf32>
    %24 = vector.extract_strided_slice %21 {offsets = [0, 0], sizes = [1, 16], strides = [1, 1]} : vector<4x16xf32> to vector<1x16xf32>
    %25 = vector.broadcast %23 : vector<8x1xf32> to vector<8x16xf32>
    %26 = vector.broadcast %24 : vector<1x16xf32> to vector<8x16xf32>
    %27 = arith.mulf %25, %26 : vector<8x16xf32>
    %28 = arith.addf %22, %27 : vector<8x16xf32>
    %c0_16 = arith.constant 0 : index
    %c1_17 = arith.constant 1 : index
    %29 = vector.load %arg5[%c0_16, %c1_17] : memref<8x4xf32, #tpu.memory_space<vmem>>, vector<8x1xf32>
    %30 = vector.extract_strided_slice %21 {offsets = [1, 0], sizes = [1, 16], strides = [1, 1]} : vector<4x16xf32> to vector<1x16xf32>
    %31 = vector.broadcast %29 : vector<8x1xf32> to vector<8x16xf32>
    %32 = vector.broadcast %30 : vector<1x16xf32> to vector<8x16xf32>
    %33 = arith.mulf %31, %32 : vector<8x16xf32>
    %34 = arith.addf %28, %33 : vector<8x16xf32>
    %c0_18 = arith.constant 0 : index
    %c2_19 = arith.constant 2 : index
    %35 = vector.load %arg5[%c0_18, %c2_19] : memref<8x4xf32, #tpu.memory_space<vmem>>, vector<8x1xf32>
    %36 = vector.extract_strided_slice %21 {offsets = [2, 0], sizes = [1, 16], strides = [1, 1]} : vector<4x16xf32> to vector<1x16xf32>
    %37 = vector.broadcast %35 : vector<8x1xf32> to vector<8x16xf32>
    %38 = vector.broadcast %36 : vector<1x16xf32> to vector<8x16xf32>
    %39 = arith.mulf %37, %38 : vector<8x16xf32>
    %40 = arith.addf %34, %39 : vector<8x16xf32>
    %c0_20 = arith.constant 0 : index
    %c3 = arith.constant 3 : index
    %41 = vector.load %arg5[%c0_20, %c3] : memref<8x4xf32, #tpu.memory_space<vmem>>, vector<8x1xf32>
    %42 = vector.extract_strided_slice %21 {offsets = [3, 0], sizes = [1, 16], strides = [1, 1]} : vector<4x16xf32> to vector<1x16xf32>
    %43 = vector.broadcast %41 : vector<8x1xf32> to vector<8x16xf32>
    %44 = vector.broadcast %42 : vector<1x16xf32> to vector<8x16xf32>
    %45 = arith.mulf %43, %44 : vector<8x16xf32>
    %46 = arith.addf %40, %45 : vector<8x16xf32>
    %c0_21 = arith.constant 0 : index
    %c0_22 = arith.constant 0 : index
    %47 = vector.load %arg6[%c0_21, %c0_22] : memref<8x1xf32, #tpu.memory_space<vmem>>, vector<8x1xf32>
    %48 = vector.broadcast %47 : vector<8x1xf32> to vector<8x16xf32>
    %49 = arith.addf %46, %48 : vector<8x16xf32>
    %c0_23 = arith.constant 0 : index
    %c0_24 = arith.constant 0 : index
    %c0_25 = arith.constant 0 : index
    %50 = vector.load %arg7[%c0_23, %c0_24, %c0_25] : memref<1x8x16xf32, #tpu.memory_space<vmem>>, vector<1x8x16xf32>
    %51 = vector.shape_cast %50 : vector<1x8x16xf32> to vector<8x16xf32>
    %52 = vector.shape_cast %49 : vector<8x16xf32> to vector<1x8x16xf32>
    tpu.vector_store %arg7[%c0_23, %c0_24, %c0_25], %52 {strides = array<i32>} : memref<1x8x16xf32, #tpu.memory_space<vmem>>, vector<1x8x16xf32>,
    return
  }
  func.func @transform_0(%arg0: i32, %arg1: i32) -> (i32, i32, i32) {
    %c0_i32 = arith.constant 0 : i32
    %c0_i32_0 = arith.constant 0 : i32
    %c0_i32_1 = arith.constant 0 : i32
    return %arg0, %c0_i32, %c0_i32_0 : i32, i32, i32
  }
  func.func @transform_1(%arg0: i32, %arg1: i32) -> (i32, i32) {
    %c0_i32 = arith.constant 0 : i32
    %c0_i32_0 = arith.constant 0 : i32
    %c0_i32_1 = arith.constant 0 : i32
    return %c0_i32, %c0_i32_0 : i32, i32
  }
  func.func @transform_2(%arg0: i32, %arg1: i32) -> (i32, i32) {
    %c0_i32 = arith.constant 0 : i32
    %c0_i32_0 = arith.constant 0 : i32
    %c0_i32_1 = arith.constant 0 : i32
    return %c0_i32, %c0_i32_0 : i32, i32
  }
  func.func @transform_3(%arg0: i32, %arg1: i32) -> (i32, i32) {
    %c0_i32 = arith.constant 0 : i32
    %c0_i32_0 = arith.constant 0 : i32
    %c0_i32_1 = arith.constant 0 : i32
    return %c0_i32, %c0_i32_0 : i32, i32
  }
  func.func @transform_4(%arg0: i32, %arg1: i32) -> (i32, i32) {
    %c0_i32 = arith.constant 0 : i32
    %c0_i32_0 = arith.constant 0 : i32
    %c0_i32_1 = arith.constant 0 : i32
    return %c0_i32, %c0_i32_0 : i32, i32
  }
  func.func @transform_5(%arg0: i32, %arg1: i32) -> (i32, i32, i32) {
    %c0_i32 = arith.constant 0 : i32
    %c0_i32_0 = arith.constant 0 : i32
    return %arg0, %c0_i32, %arg1 : i32, i32, i32
  }
}

</mosaic_0001>

<bundles_post_ra>
// kernel: tpu_custom_call.1
= control target key start
LH: loop header
LB: loop body
LE: loop exit
PB: predicated region body
PF: predicated region fallthrough
CT: control target
= control target key end

     0   :  { %10 = vsyncpa [#allocation3], 0  ;;  %s726_s0 = inlined_call_operand.vmem [shape: f32[2,4,20], index: 0, kind: input, shape index: {}]   ;;  %s727_s1 = inlined_call_operand.vmem [shape: f32[4,3], index: 1, kind: input, shape index: {}]   ;;  %s728_s2 = inlined_call_operand.vmem [shape: f32[4,1], index: 2, kind: input, shape index: {}]   ;;  %s729_s3 = inlined_call_operand.vmem [shape: f32[8,4], index: 3, kind: input, shape index: {}]   ;;  %s730_s4 = inlined_call_operand.vmem [shape: f32[8,1], index: 4, kind: input, shape index: {}]   ;;  %s731_s5 = inlined_call_operand.hbm [shape: f32[2,8,16], index: 5, kind: output, shape index: {}]  }
   0x1   :  { %12 = vsyncpa [#allocation3 + $0x1], 0  ;;  %s602_s18 = smov 0   ;;  %s604_s19 = smov 0  }
   0x2   :  { %s606_s20 = smov 0   ;;  %s608_s21 = smov 0  }
   0x3   :  { %s610_s22 = smov 0   ;;  %s612_s23 = smov 0  }
   0x4 LB: > { %s404_s24 = sadd.s32 4294967295, %s563_s23   ;;  %s405_s25 = sadd.s32 4294967294, %s563_s23   ;;  %s563_s23 = sphi %s612_s23, %s18_s23   ;;  %s559_s22 = sphi %s610_s22, %s738_s22   ;;  %s555_s21 = sphi %s608_s21, %s737_s21   ;;  %s551_s20 = sphi %s606_s20, %s736_s20   ;;  %s547_s19 = sphi %s604_s19, %s735_s19   ;;  %s543_s18 = sphi %s602_s18, %s734_s18  }
   0x5   : > { %s30_s26 = sadd.s32 1, %s559_s22  ;;  %s149_s27 = sadd.s32 1, %s551_s20 }
   0x6   : > { %p32_p0 = scmp.ge.s32.totalorder %s30_s26, 2  ;;  %p159_p1 = scmp.ne.s32.totalorder %s551_s20, %s547_s19 }
   0x7   : > { %p160_p2 = scmp.eq.s32.totalorder %s404_s24, 1  ;;  %p165_p3 = scmp.ne.s32.totalorder %s547_s19, %s543_s18 }
   0x8   : > { %s740_s26 = smov (%p32_p0, %s30_s26), 0  ;;  %p166_p5 = scmp.eq.s32.totalorder %s405_s25, 1 }
   0x9   : > { %p642_p4 = por %p160_p2, %p159_p1  ;;  %s144_s29 = ssub.s32 %s559_s22, %s740_s26 }
   0xa   : > { %p408_p6 = scmp.ge.s32.totalorder %s563_s23, 1  ;;  %p147_p7 = scmp.eq.s32.totalorder %s144_s29, 0 }
   0xb   : > { %p649_p8 = por %p166_p5, %p165_p3  ;;  %p203_p9 = scmp.lt.s32.totalorder %s563_s23, 3 }
   0xc   : > { %s655_s6 = scalar_select %p147_p7, %s551_s20, %s149_s27  }
   0xd   : > { %p204_p10 = pnand %p408_p6, %p203_p9 }
   0xe   : > { %v235_v0 = vld [vmem:[%s727_s1] sm:$0xf] (!%p204_p10)  ;;  %v565_v1 = vmov (!%p204_p10), 1   ;;  %v566_v2 = vmov (!%p204_p10), 0   ;;  %v567_v4 = vmov (!%p204_p10), 2   ;;  %v568_v6 = vmov (!%p204_p10), 3  }
   0xf   : > { %207 = sbr.rel (%p204_p10) target bundleno = 304 (0x130), region = 40  ;;  %476 = vset.pattern.permute.xlu0 (!%p204_p10), %v565_v1  ;;  %478 = vset.pattern.permute.xlu1 (!%p204_p10), %v566_v2  ;;  %v263_v3 = vld [vmem:[%s728_s2] sm:$0xf] (!%p204_p10)  ;;  %p230_p11 = scmp.lt.s32.totalorder (!%p204_p10), %s555_s21, 1  ;;  %v276_v16 = vlaneseq (!%p204_p10)  ;;  %vm319_vm0 = vcmask (!%p204_p10), 130048  }
  0x10   : > { %244 = vperm.xlu0 (!%p204_p10), %476, %v235_v0   ;;  %238 = vperm.xlu1 (!%p204_p10), %478, %v235_v0   ;;  %v270_v5 = vld [vmem:[%s729_s3] sm:$0xff] (!%p204_p10)  ;;  %s569_s24 = smov (!%p204_p10), 126   ;;  %s570_s25 = smov (!%p204_p10), 124  }
  0x11   : > { %v312_v12 = vld [vmem:[%s730_s4] sm:$0xff] (!%p204_p10)  ;;  %v277_v19 = vshrl.u32 (!%p204_p10), %v276_v16, 7  ;;  %s227_s7 = sand.u32 (!%p204_p10), 1, %s547_s19   ;;  %s412_s9 = sshll.u32 (!%p204_p10), %s555_s21, 7 }
  0x12   : > { %s409_s8 = sshll.u32 (!%p204_p10), %s227_s7, 3  ;;  %s322_s15 = scalar_lea.sflag (!%p204_p10), [#allocation3], %s227_s7 }
  0x13   : > { %v278_v23 = vsub.s32 (!%p204_p10), 0, %v277_v19  ;;  %v288_v24 = vsub.s32 (!%p204_p10), 1, %v277_v19  ;;  %v298_v29 = vsub.s32 (!%p204_p10), 2, %v277_v19  ;;  %v308_v33 = vsub.s32 (!%p204_p10), 3, %v277_v19  ;;  %s229_s10 = scalar_lea.vmem (!%p204_p10), [#allocation2], %s409_s8 }
  0x14   : > { %477 = vset.pattern.permute.xlu0 (!%p204_p10), %v567_v4  ;;  %266 = vperm.xlu1 (!%p204_p10), %478, %v263_v3   ;;  %s336_s11 = sshll.u32 (!%p204_p10), %s229_s10, 4  ;;  %s681_s11 = int_to_ptr.vmem [resolvable:$true] %s336_s11 }
  0x15   : > { %254 = vperm.xlu0 (!%p204_p10), %477, %v235_v0   ;;  %s485_s16 = scalar_lea.vmem (!%p204_p10), %s681_s11, 128 }
  0x16   : > { %s231_s13 = scalar_select %p230_p11, %s555_s21, 1 }
  0x17   : > { %p486_p12 = scmp.ne.s32.totalorder %s681_s11, %s485_s16  ;;  %s571_s21 = smov [#allocation2]  }
  0x18   : > { %480 = vset.pattern.permute.xlu1 %v565_v1  ;;  %s410_s14 = sshll.u32 %s231_s13, 2 }
  0x19   : > { %283 = vperm.xlu1 %480, %v270_v5   ;;  %479 = vset.pattern.permute.xlu0 %v566_v2  ;;  %s233_s17 = scalar_lea.vmem %s726_s0, %s410_s14  ;;  %s679_s14 = scalar_lea.hbm %s731_s5, %s412_s9 }
  0x1a   : > { %273 = vperm.xlu0 %479, %v270_v5   ;;  %v234_v7 = vld [vmem:[%s233_s17] sm:$0xf]  ;;  %p487_p13 = pnand %p486_p12, %p642_p4  ;;  %s489_s17 = sshll.u32 %s571_s21, 4  ;;  %s490_s17 = int_to_ptr.vmem [resolvable:$false] %s489_s17 }
  0x1b   : > { %p492_p1 = scmp.lt.s32.totalorder %s681_s11, %s490_s17 }
  0x1c   : > { %p488_p0 = pneg %p487_p13 }
  0x1d   : > { %482 = vset.pattern.permute.xlu1 %v568_v6 }
  0x1e   : > { %481 = vset.pattern.permute.xlu0 %v567_v4 }
  0x1f   : > { %293 = vperm.xlu0 %481, %v270_v5  }
  0x23   : > { %484 = vset.pattern.permute.xlu0 %v566_v2 }
  0x8f   : > { %v245_v8 = vpop.permute.xlu0 %244  ;;  %v239_v13 = vpop.permute.xlu1 %238 }
  0x90   : > { %v247_v9 = vmul.f32 %v245_v8, %v234_v7  ;;  %v241_v18 = vmul.f32 %v239_v13, %v234_v7 }
  0x92   : > { %249 = vrot.lane.b32.xlu1 %v247_v9, %s569_s24  ;;  %s491_s24 = scalar_lea.vmem %s490_s17, 256 }
  0x93   : > { %v267_v14 = vpop.permute.xlu1 %266  ;;  %p493_p2 = scmp.lt.s32.totalorder %s491_s24, %s485_s16 }
  0x94   : > { %v255_v10 = vpop.permute.xlu0 %254 }
  0x95   : > { %v257_v11 = vmul.f32 %v255_v10, %v234_v7  ;;  %p494_p3 = por %p493_p2, %p492_p1 }
  0x97   : > { %259 = vrot.lane.b32.xlu1 %v257_v11, %s570_s25  ;;  %p495_p5 = pnand %p494_p3, %p488_p0 }
  0x98   : > { %v284_v15 = vpop.permute.xlu1 %283 }
  0x99   : > { %v274_v28 = vpop.permute.xlu0 %273 }
  0x9b   : > { %303 = vperm.xlu1 %482, %v270_v5  }
  0x9e   : > { %v294_v34 = vpop.permute.xlu0 %293 }
  0x9f   : > { %483 = vset.pattern.permute.xlu1 %v566_v2 }
  0xa0   : > { %315 = vperm.xlu1 %483, %v312_v12  }
 0x104   : > { %v250_v17 = vpop.permute.xlu1 %249 }
 0x105   : > { %v252_v20 = vadd.f32 %v250_v17, %v241_v18 }
 0x109   : > { %v260_v21 = vpop.permute.xlu1 %259 }
 0x10a   : > { %v262_v22 = vadd.f32 %v260_v21, %v252_v20 }
 0x10c   : > { %v269_v25 = vadd.f32 %v267_v14, %v262_v22 }
 0x10e   : > { %v279_v26 = vrot.slane %v269_v25, %v278_v23  ;;  %v289_v27 = vrot.slane %v269_v25, %v288_v24  ;;  %v299_v32 = vrot.slane %v269_v25, %v298_v29  ;;  %v309_v37 = vrot.slane %v269_v25, %v308_v33 }
 0x110   : > { %v280_v30 = vmul.f32 %v279_v26, %v274_v28  ;;  %v290_v31 = vmul.f32 %v289_v27, %v284_v15  ;;  %v300_v36 = vmul.f32 %v299_v32, %v294_v34 }
 0x112   : > { %v291_v35 = vadd.f32 %v290_v31, %v280_v30 }
 0x114   : > { %v301_v39 = vadd.f32 %v300_v36, %v291_v35 }
 0x11a   : > { %v304_v38 = vpop.permute.xlu1 %303 }
 0x11b   : > { %v310_v40 = vmul.f32 %v309_v37, %v304_v38 }
 0x11d   : > { %v311_v41 = vadd.f32 %v310_v40, %v301_v39 }
 0x11f   : > { %v316_v42 = vpop.permute.xlu1 %315 }
 0x120   : > { %v318_v43 = vadd.f32 %v316_v42, %v311_v41 }
 0x122   : > { %320 = vst.msk [vmem:[%s229_s10] sm:$0xff] %vm319_vm0, %v318_v43 }
 0x123   : > { %498 = shalt.err (!%p495_p5)
}
 0x124   : > { %s499_s25 = scalar_lea.hbm %s679_s14, 128  ;;  %s503_s7 = scalar_lea.hbm %s731_s5, 256 }
 0x125   : > { %p500_p6 = scmp.ne.s32.totalorder %s679_s14, %s499_s25  ;;  %p504_p10 = scmp.lt.u32.totalorder %s679_s14, %s731_s5 }
 0x126   : > { %p505_p11 = scmp.lt.u32.totalorder %s503_s7, %s499_s25  ;;  %p507_p13 = scmp.lt.u32.totalorder %s499_s25, %s679_s14 }
 0x127   : > { %p501_p7 = pnand %p500_p6, %p642_p4 }
 0x128   : > { %p506_p12 = por %p505_p11, %p504_p10 }
 0x129   : > { %p502_p9 = pneg %p501_p7 }
 0x12a   : > { %p508_p0 = por %p507_p13, %p506_p12 }
 0x12c   : > { %p509_p1 = pnand %p508_p0, %p502_p9 }
 0x12e   : > { %512 = shalt.err (!%p509_p1)
}
 0x12f   : > { %415 = dma.vmem_to_hbm [thread:$0]  (%p642_p4), %s681_s11, 128, %s679_s14, %s322_s15  }
 0x130 PF: > { %p421_p2 = scmp.ge.s32.totalorder %s563_s23, 2  ;;  %s348_s10 = sand.u32 1, %s543_s18  }
 0x131   : > { %s349_s12 = scalar_lea.sflag [#allocation3], %s348_s10 }
 0x132   : > { %p418_p3 = pnand %p421_p2, %p649_p8 }
 0x134   : > { %538 = dma.done.wait (!%p418_p3), %s349_s12, 128  }
 0x135   : > { %540 = vsyncadd (!%p418_p3), %s349_s12, 4294967168  ;;  %s18_s23 = sadd.s32 1, %s563_s23   ;;  %s734_s18 = smov %s547_s19 }
 0x136   : > { %p15_p5 = scmp.ge.s32.totalorder %s18_s23, 4   ;;  %s735_s19 = smov %s551_s20 }
 0x137   : > { %s736_s20 = smov %s655_s6  ;;  %s737_s21 = smov %s559_s22 }
 0x138   : > { %s738_s22 = smov %s740_s26  ;;  %17 = sbr.rel (!%p15_p5) target bundleno = 4 (0x4), region = 75 }
 0x13f   :  { %354 = vsyncpa [#allocation3], 1 }
 0x140   :  { %356 = vsyncpa [#allocation3 + $0x1], 1 }

</bundles_post_ra>
